<compile_context>
chip_gen: v6e
topology: v6e:2x2x1
jax: 0.10.0
libtpu: 0.0.40
codegen_flags: <defaults>
</compile_context>

<pallas_src>
import functools
import math

import jax
import jax.numpy as jnp
from jax.experimental import pallas as pl
from jax.experimental.pallas import tpu as pltpu

LANE = 128
SUBLANE = 8


# --------------------------------------------------------------------------
# Small helpers (tile selection / VMEM budgeting)
# --------------------------------------------------------------------------
def _round_up(x, m):
    return (x + m - 1) // m * m


def _largest_divisor_leq(n, cap):
    cap = max(1, min(n, cap))
    for d in range(cap, 0, -1):
        if n % d == 0:
            return d
    return 1


def _pick_kv_block(s_kv, cap):
    """Largest divisor of s_kv <= cap, preferring sublane-aligned (x8) tiles."""
    cap = max(1, min(s_kv, cap))
    for d in range(cap - cap % SUBLANE, 0, -SUBLANE):
        if s_kv % d == 0:
            return d
    return _largest_divisor_leq(s_kv, cap)


def _vmem_capacity_bytes(default=64 * 1024 * 1024):
    try:
        cap = int(getattr(pltpu.get_tpu_info(), "vmem_capacity_bytes", default))
        return cap if cap > 0 else default
    except Exception:
        return default


def _tile_bytes(b, rows, cols, itemsize):
    """VMEM footprint of a (b, rows, cols) tile after (8, 128) layout padding."""
    return (b * _round_up(max(rows, 1), SUBLANE)
            * _round_up(max(cols, 1), LANE) * itemsize)


def _vmem_bytes_estimate(bb, kvb, s_q, d_q, d_in_eff, dk_pad, dout_pad,
                         itemsize, residual):
    f32 = 4
    total = 0
    # Double-buffered pipeline operands.
    total += 2 * _tile_bytes(bb, s_q, d_q, itemsize)          # querys tile
    total += 2 * _tile_bytes(bb, kvb, d_in_eff, itemsize)     # x (K/V source) tile
    total += 2 * _tile_bytes(bb, s_q, dout_pad, itemsize)     # output tile
    total += 2 * (_tile_bytes(1, d_q, dk_pad, itemsize)
                  + _tile_bytes(1, d_in_eff, dk_pad + dout_pad, itemsize))  # weights
    if residual:
        total += 2 * _tile_bytes(bb, s_q, d_in_eff, itemsize)  # resident x (residual)
    # Persistent scratch.
    total += _tile_bytes(bb, s_q, dk_pad, f32)                 # scaled Q
    total += 2 * _tile_bytes(bb, s_q, 1, f32)                  # m, l
    total += _tile_bytes(bb, s_q, dout_pad, f32)               # PV accumulator
    # In-kernel intermediates (KV projection, scores, probabilities, PV result).
    total += _tile_bytes(bb, kvb, dk_pad + dout_pad, f32)
    total += 2 * _tile_bytes(bb, s_q, kvb, f32)
    total += _tile_bytes(bb, s_q, dout_pad, f32)
    return int(total * 1.2)  # headroom for relayouts / temporaries


def _pick_tiles(batch, s_q, s_kv, d_q, d_in_eff, dk_pad, dout_pad, itemsize,
                residual, vmem_budget):
    # Keep >= 2 steps on the parallel batch axis when possible so v7x's second
    # TensorCore gets work; v5e/v6e (1 TC) are unaffected.
    bb_cap = min(8, batch // 2) if batch >= 2 else 1
    bb = _largest_divisor_leq(batch, bb_cap)
    kvb = _pick_kv_block(s_kv, 2048)
    while (_vmem_bytes_estimate(bb, kvb, s_q, d_q, d_in_eff, dk_pad, dout_pad,
                                itemsize, residual) > vmem_budget
           and (kvb > 8 or bb > 1)):
        if kvb > 8:
            kvb = _pick_kv_block(s_kv, max(8, kvb // 2))
        else:
            bb = _largest_divisor_leq(batch, max(1, bb // 2))
    # TODO(synk): also tile S_q if a single (bb, S_q) slab still overflows the
    # budget at extreme sequence lengths.
    return bb, kvb


# --------------------------------------------------------------------------
# Kernel
# --------------------------------------------------------------------------
def _mq_attn_kernel(q_in_ref, x_ref, wq_ref, wkv_ref, *rest, scale, residual):
    if residual:
        xres_ref, o_ref, q_scr, m_scr, l_scr, acc_scr = rest
    else:
        o_ref, q_scr, m_scr, l_scr, acc_scr = rest

    kv_step = pl.program_id(1)
    tb, s_q, d_q = q_in_ref.shape
    _, t_kv, d_in = x_ref.shape
    dk_pad = wq_ref.shape[-1]          # lane-aligned (multiple of 128)
    d_out_pad = o_ref.shape[-1]        # lane-aligned (multiple of 128)

    # ---- Once per batch block: Q projection (pre-scaled) + accumulator init.
    @pl.when(kv_step == 0)
    def _():
        q2d = q_in_ref[...].reshape(tb * s_q, d_q)
        q = jnp.dot(q2d, wq_ref[...], preferred_element_type=jnp.float32)
        # 1/sqrt(key_dim) applied to q (S_q x Dk) rather than to the
        # (S_q x S_kv) scores -> far fewer VALU multiplies at large S_kv.
        q_scr[...] = (q * scale).reshape(tb, s_q, dk_pad)
        m_scr[...] = jnp.full_like(m_scr, -jnp.inf)
        l_scr[...] = jnp.zeros_like(l_scr)
        acc_scr[...] = jnp.zeros_like(acc_scr)

    # ---- Fused K|V projection for this kv tile (split is 128-lane aligned).
    x2d = x_ref[...].reshape(tb * t_kv, d_in)
    kv = jnp.dot(x2d, wkv_ref[...], preferred_element_type=jnp.float32)
    k = kv[:, :dk_pad].reshape(tb, t_kv, dk_pad)
    v = kv[:, dk_pad:].reshape(tb, t_kv, d_out_pad)

    # ---- Online (flash-style) softmax over the kv axis; f32 elementwise path.
    s = jnp.einsum('bqd,bkd->bqk', q_scr[...], k,
                   preferred_element_type=jnp.float32)
    m_prev = m_scr[...]
    m_new = jnp.maximum(m_prev, jnp.max(s, axis=-1, keepdims=True))
    alpha = jnp.exp(m_prev - m_new)
    p = jnp.exp(s - m_new)
    l_scr[...] = alpha * l_scr[...] + jnp.sum(p, axis=-1, keepdims=True)

    if x_ref.dtype == jnp.bfloat16:
        # bf16 PV matmul on bf16-MXU generations (v6e/v7x); f32 accumulation.
        p_mm, v_mm = p.astype(jnp.bfloat16), v.astype(jnp.bfloat16)
    else:
        # f32 inputs stay exact; v5e has no bf16 VPU/EUP path anyway.
        p_mm, v_mm = p, v
    acc_scr[...] = alpha * acc_scr[...] + jnp.einsum(
        'bqk,bkd->bqd', p_mm, v_mm, preferred_element_type=jnp.float32)
    m_scr[...] = m_new

    # ---- Finalize: normalize (EUP reciprocal), residual add, lane-dense store.
    @pl.when(kv_step == pl.num_programs(1) - 1)
    def _():
        out = acc_scr[...] * pl.reciprocal(l_scr[...], approx=True)
        if residual:
            if o_ref.dtype == jnp.bfloat16:
                o_ref[...] = (out.astype(o_ref.dtype)
                              + xres_ref[...].astype(o_ref.dtype))
            else:
                o_ref[...] = (out + xres_ref[...].astype(jnp.float32)
                              ).astype(o_ref.dtype)
        else:
            o_ref[...] = out.astype(o_ref.dtype)


# --------------------------------------------------------------------------
# Wrapper
# --------------------------------------------------------------------------
def mq_attn_prepare(query_proj, key_proj, value_proj, residual=False, dtype=None):
    """Cast, zero-pad to 128-lane multiples, and fuse the K|V projection.

    Call once per parameter set and reuse the result across forward calls so
    the pad/concat does not re-materialize the weights in HBM every call.
    """
    query_dim, key_dim = query_proj.shape
    in_dim, key_dim2 = key_proj.shape
    in_dim2, out_dim = value_proj.shape
    assert key_dim2 == key_dim and in_dim2 == in_dim
    if dtype is None:
        dtype = jnp.result_type(query_proj.dtype, key_proj.dtype, value_proj.dtype)

    dk_pad = _round_up(key_dim, LANE)
    dout_pad = _round_up(out_dim, LANE)
    # With a fused residual, x is padded to the lane-aligned output width, so
    # the K/V weights get matching zero rows (they contribute nothing).
    d_in_eff = _round_up(in_dim, LANE) if residual else in_dim

    wq = jnp.zeros((query_dim, dk_pad), dtype)
    wq = wq.at[:, :key_dim].set(query_proj.astype(dtype))
    wkv = jnp.zeros((d_in_eff, dk_pad + dout_pad), dtype)
    wkv = wkv.at[:in_dim, :key_dim].set(key_proj.astype(dtype))
    wkv = wkv.at[:in_dim, dk_pad:dk_pad + out_dim].set(value_proj.astype(dtype))

    dims = dict(query_dim=query_dim, key_dim=key_dim, in_dim=in_dim,
                out_dim=out_dim, dk_pad=dk_pad, dout_pad=dout_pad,
                d_in_eff=d_in_eff, dtype=dtype, residual=residual)
    return wq, wkv, dims


def mq_attn_pallas(x, querys, query_proj=None, key_proj=None, value_proj=None,
                   residual=False, prepared=None, batch_block=None,
                   kv_block=None):
    """x: (B, S_kv, in_dim), querys: (B, S_q, query_dim) -> (B, S_q, out_dim)."""
    B, S_kv, in_dim = x.shape
    Bq, S_q, query_dim = querys.shape
    assert Bq == B

    if prepared is None:
        prepared = mq_attn_prepare(query_proj, key_proj, value_proj,
                                   residual=residual)
    wq, wkv, dims = prepared
    assert dims["residual"] == residual
    assert dims["in_dim"] == in_dim and dims["query_dim"] == query_dim
    key_dim, out_dim = dims["key_dim"], dims["out_dim"]
    dk_pad, dout_pad = dims["dk_pad"], dims["dout_pad"]
    d_in_eff = dims["d_in_eff"]

    if residual:
        # Matches the torch module's implicit assumption for `outputs += x`.
        assert S_q == S_kv and out_dim == in_dim, \
            "residual add requires out and x to have matching shapes"

    out_dtype = jnp.result_type(x.dtype, querys.dtype, dims["dtype"])

    # Pad x's feature dim only when the residual add is fused, so the add and
    # the output stores stay 128-lane dense. Zero features are inert.
    x_eff = x
    if d_in_eff != in_dim:
        x_eff = jnp.pad(x, ((0, 0), (0, 0), (0, d_in_eff - in_dim)))

    vmem_cap = _vmem_capacity_bytes()
    bb, kvb = _pick_tiles(B, S_q, S_kv, query_dim, d_in_eff, dk_pad, dout_pad,
                          jnp.dtype(out_dtype).itemsize, residual,
                          vmem_budget=vmem_cap // 2)
    if batch_block is not None:
        bb = batch_block
    if kv_block is not None:
        kvb = kv_block
    assert B % bb == 0 and S_kv % kvb == 0
    grid = (B // bb, S_kv // kvb)

    kernel = functools.partial(_mq_attn_kernel,
                               scale=1.0 / math.sqrt(float(key_dim)),
                               residual=residual)

    in_specs = [
        pl.BlockSpec((bb, S_q, query_dim), lambda b, k: (b, 0, 0)),     # querys
        pl.BlockSpec((bb, kvb, d_in_eff), lambda b, k: (b, k, 0)),      # x (K/V)
        pl.BlockSpec((query_dim, dk_pad), lambda b, k: (0, 0)),         # wq (resident)
        pl.BlockSpec((d_in_eff, dk_pad + dout_pad), lambda b, k: (0, 0)),  # wkv (resident)
    ]
    inputs = [querys, x_eff, wq, wkv]
    if residual:
        # Full (per-batch-block) x slab, resident across the kv axis.
        in_specs.append(pl.BlockSpec((bb, S_q, d_in_eff), lambda b, k: (b, 0, 0)))
        inputs.append(x_eff)

    out_p = pl.pallas_call(
        kernel,
        out_shape=jax.ShapeDtypeStruct((B, S_q, dout_pad), out_dtype),
        grid_spec=pltpu.PrefetchScalarGridSpec(
            num_scalar_prefetch=0,
            grid=grid,
            in_specs=in_specs,
            out_specs=pl.BlockSpec((bb, S_q, dout_pad), lambda b, k: (b, 0, 0)),
            scratch_shapes=[
                pltpu.VMEM((bb, S_q, dk_pad), jnp.float32),     # scaled Q
                pltpu.VMEM((bb, S_q, 1), jnp.float32),          # running max
                pltpu.VMEM((bb, S_q, 1), jnp.float32),          # running sum
                pltpu.VMEM((bb, S_q, dout_pad), jnp.float32),   # running PV acc
            ],
        ),
        compiler_params=pltpu.CompilerParams(
            dimension_semantics=("parallel", "arbitrary"),
            vmem_limit_bytes=int(vmem_cap * 3 // 4),
        ),
    )(*inputs)

    return out_p[..., :out_dim] if dout_pad != out_dim else out_p


def mq_attn_ref(x, querys, query_proj, key_proj, value_proj, residual=False):
    """Plain-JAX reference mirroring the PyTorch forward."""
    q = jnp.einsum('bei,ij->bej', querys, query_proj)
    k = jnp.einsum('bei,ij->bej', x, key_proj)
    v = jnp.einsum('bei,ij->bej', x, value_proj)
    pre = jnp.einsum('bxj,byj->bxy', q, k) / math.sqrt(float(k.shape[-1]))
    w = jax.nn.softmax(pre, axis=2)
    out = jnp.einsum('bey,byj->bej', w, v)
    if residual:
        out = out + x
    return out


if __name__ == "__main__":
    # Small, forward-consistent shapes (S_q == S_kv, out_dim == in_dim so the
    # residual path is also exercised).
    B, S_kv, S_q = 2, 8, 8
    in_dim, query_dim, key_dim, out_dim = 32, 16, 32, 32

    key = jax.random.PRNGKey(0)
    kx, kq, kwq, kwk, kwv = jax.random.split(key, 5)

    x = jax.random.normal(kx, (B, S_kv, in_dim), dtype=jnp.float32)
    querys = jax.random.normal(kq, (B, S_q, query_dim), dtype=jnp.float32)

    # Deterministic parameter init matching reset_parameters():
    # uniform(-stdv, stdv) with stdv = 1/sqrt(last-dim).
    q_stdv = 1.0 / math.sqrt(key_dim)
    k_stdv = 1.0 / math.sqrt(key_dim)
    v_stdv = 1.0 / math.sqrt(out_dim)
    query_proj = jax.random.uniform(kwq, (query_dim, key_dim), jnp.float32,
                                    minval=-q_stdv, maxval=q_stdv)
    key_proj = jax.random.uniform(kwk, (in_dim, key_dim), jnp.float32,
                                  minval=-k_stdv, maxval=k_stdv)
    value_proj = jax.random.uniform(kwv, (in_dim, out_dim), jnp.float32,
                                    minval=-v_stdv, maxval=v_stdv)

    for res in (False, True):
        # Weight prep (cast + pad + fuse) done once per parameter set; reuse
        # `prep` across forward calls in real use.
        prep = mq_attn_prepare(query_proj, key_proj, value_proj, residual=res)
        out = mq_attn_pallas(x, querys, residual=res, prepared=prep)
        out = jax.block_until_ready(out)
        ref = mq_attn_ref(x, querys, query_proj, key_proj, value_proj,
                          residual=res)
        assert out.shape == ref.shape == (B, S_q, out_dim)
        # approx=True EUP reciprocal in the softmax normalization introduces
        # ~1e-4-level relative error; attention outputs are O(1), so a 2e-3
        # tolerance is a safe correctness bound here.
        assert jnp.allclose(out, ref, atol=2e-3, rtol=2e-3), \
            f"mismatch vs reference (residual={res})"

    print("KERNEL_OK")
</pallas_src>

<mosaic_0001>
module attributes {stable_mosaic.version = 11 : i64} {
  func.func @_mq_attn_kernel(%arg0: i32, %arg1: i32, %arg2: memref<1x8x16xf32, #tpu.memory_space<vmem>>, %arg3: memref<1x8x32xf32, #tpu.memory_space<vmem>>, %arg4: memref<16x128xf32, #tpu.memory_space<vmem>>, %arg5: memref<32x256xf32, #tpu.memory_space<vmem>>, %arg6: memref<1x8x128xf32, #tpu.memory_space<vmem>>, %arg7: memref<1x8x128xf32, #tpu.memory_space<vmem>>, %arg8: memref<1x8x1xf32, #tpu.memory_space<vmem>>, %arg9: memref<1x8x1xf32, #tpu.memory_space<vmem>>, %arg10: memref<1x8x128xf32, #tpu.memory_space<vmem>>) attributes {dimension_semantics = [#tpu.dimension_semantics<parallel>, #tpu.dimension_semantics<arbitrary>], iteration_bounds = array<i64: 2, 1>, scalar_prefetch = 0 : i64, scratch_operands = 4 : i64, tpu.core_type = #tpu.core_type<tc>, window_params = [{transform_indices = @transform_0, window_bounds = array<i64: 1, 8, 16>}, {transform_indices = @transform_1, window_bounds = array<i64: 1, 8, 32>}, {pipeline_mode = #tpu.pipeline_mode<synchronous>, transform_indices = @transform_2, window_bounds = array<i64: 16, 128>}, {pipeline_mode = #tpu.pipeline_mode<synchronous>, transform_indices = @transform_3, window_bounds = array<i64: 32, 256>}, {transform_indices = @transform_4, window_bounds = array<i64: 1, 8, 128>}]} {
    %c0_i32 = arith.constant 0 : i32
    %0 = arith.cmpi eq, %arg1, %c0_i32 : i32
    %1 = arith.extui %0 : i1 to i32
    %c0_i32_0 = arith.constant 0 : i32
    %2 = arith.cmpi ne, %1, %c0_i32_0 : i32
    scf.if %2 {
      %c0_32 = arith.constant 0 : index
      %c0_33 = arith.constant 0 : index
      %c0_34 = arith.constant 0 : index
      %38 = vector.load %arg2[%c0_32, %c0_33, %c0_34] : memref<1x8x16xf32, #tpu.memory_space<vmem>>, vector<1x8x16xf32>
      %39 = vector.shape_cast %38 : vector<1x8x16xf32> to vector<8x16xf32>
      %c0_35 = arith.constant 0 : index
      %c0_36 = arith.constant 0 : index
      %40 = vector.load %arg4[%c0_35, %c0_36] : memref<16x128xf32, #tpu.memory_space<vmem>>, vector<16x128xf32>
      %cst_37 = arith.constant dense<0.000000e+00> : vector<8x128xf32>
      %41 = tpu.matmul %39, %40, %cst_37 {dimension_numbers = #tpu.dot_dimension_numbers<[1], [0], [0], [1], [0, 0, 1, 1], [], []>} : vector<8x16xf32>, vector<16x128xf32>, vector<8x128xf32> -> vector<8x128xf32>
      %cst_38 = arith.constant 0.176776692 : f32
      %42 = vector.broadcast %cst_38 : f32 to vector<8x128xf32>
      %43 = arith.mulf %41, %42 : vector<8x128xf32>
      %44 = vector.shape_cast %43 : vector<8x128xf32> to vector<1x8x128xf32>
      %c0_39 = arith.constant 0 : index
      %c0_40 = arith.constant 0 : index
      %c0_41 = arith.constant 0 : index
      %45 = vector.load %arg7[%c0_39, %c0_40, %c0_41] : memref<1x8x128xf32, #tpu.memory_space<vmem>>, vector<1x8x128xf32>
      tpu.vector_store %arg7[%c0_39, %c0_40, %c0_41], %44 {strides = array<i32>} : memref<1x8x128xf32, #tpu.memory_space<vmem>>, vector<1x8x128xf32>,
      %cst_42 = arith.constant 0xFF800000 : f32
      %46 = vector.broadcast %cst_42 : f32 to vector<1x8x1xf32>
      %c0_43 = arith.constant 0 : index
      %c0_44 = arith.constant 0 : index
      %c0_45 = arith.constant 0 : index
      %47 = vector.load %arg8[%c0_43, %c0_44, %c0_45] : memref<1x8x1xf32, #tpu.memory_space<vmem>>, vector<1x8x1xf32>
      tpu.vector_store %arg8[%c0_43, %c0_44, %c0_45], %46 {strides = array<i32>} : memref<1x8x1xf32, #tpu.memory_space<vmem>>, vector<1x8x1xf32>,
      %cst_46 = arith.constant 0.000000e+00 : f32
      %48 = vector.broadcast %cst_46 : f32 to vector<1x8x1xf32>
      %c0_47 = arith.constant 0 : index
      %c0_48 = arith.constant 0 : index
      %c0_49 = arith.constant 0 : index
      %49 = vector.load %arg9[%c0_47, %c0_48, %c0_49] : memref<1x8x1xf32, #tpu.memory_space<vmem>>, vector<1x8x1xf32>
      tpu.vector_store %arg9[%c0_47, %c0_48, %c0_49], %48 {strides = array<i32>} : memref<1x8x1xf32, #tpu.memory_space<vmem>>, vector<1x8x1xf32>,
      %cst_50 = arith.constant 0.000000e+00 : f32
      %50 = vector.broadcast %cst_50 : f32 to vector<1x8x128xf32>
      %c0_51 = arith.constant 0 : index
      %c0_52 = arith.constant 0 : index
      %c0_53 = arith.constant 0 : index
      %51 = vector.load %arg10[%c0_51, %c0_52, %c0_53] : memref<1x8x128xf32, #tpu.memory_space<vmem>>, vector<1x8x128xf32>
      tpu.vector_store %arg10[%c0_51, %c0_52, %c0_53], %50 {strides = array<i32>} : memref<1x8x128xf32, #tpu.memory_space<vmem>>, vector<1x8x128xf32>,
    } else {
    }
    %c0 = arith.constant 0 : index
    %c0_1 = arith.constant 0 : index
    %c0_2 = arith.constant 0 : index
    %3 = vector.load %arg3[%c0, %c0_1, %c0_2] : memref<1x8x32xf32, #tpu.memory_space<vmem>>, vector<1x8x32xf32>
    %4 = vector.shape_cast %3 : vector<1x8x32xf32> to vector<8x32xf32>
    %c0_3 = arith.constant 0 : index
    %c0_4 = arith.constant 0 : index
    %5 = vector.load %arg5[%c0_3, %c0_4] : memref<32x256xf32, #tpu.memory_space<vmem>>, vector<32x256xf32>
    %cst = arith.constant dense<0.000000e+00> : vector<8x256xf32>
    %6 = tpu.matmul %4, %5, %cst {dimension_numbers = #tpu.dot_dimension_numbers<[1], [0], [0], [1], [0, 0, 1, 1], [], []>} : vector<8x32xf32>, vector<32x256xf32>, vector<8x256xf32> -> vector<8x256xf32>
    %7 = vector.extract_strided_slice %6 {offsets = [0, 0], sizes = [8, 128], strides = [1, 1]} : vector<8x256xf32> to vector<8x128xf32>
    %8 = vector.shape_cast %7 : vector<8x128xf32> to vector<1x8x128xf32>
    %9 = vector.extract_strided_slice %6 {offsets = [0, 128], sizes = [8, 128], strides = [1, 1]} : vector<8x256xf32> to vector<8x128xf32>
    %10 = vector.shape_cast %9 : vector<8x128xf32> to vector<1x8x128xf32>
    %c0_5 = arith.constant 0 : index
    %c0_6 = arith.constant 0 : index
    %c0_7 = arith.constant 0 : index
    %11 = vector.load %arg7[%c0_5, %c0_6, %c0_7] : memref<1x8x128xf32, #tpu.memory_space<vmem>>, vector<1x8x128xf32>
    "tpu.trace_start"() <{level = 10 : i32, message = "bqd,bkd->bqk"}> : () -> ()
    %cst_8 = arith.constant dense<0.000000e+00> : vector<1x8x8xf32>
    %12 = tpu.matmul %11, %8, %cst_8 {dimension_numbers = #tpu.dot_dimension_numbers<[2], [2], [1], [1], [0, 0, 0, 1, 1, 1], [0], [0]>} : vector<1x8x128xf32>, vector<1x8x128xf32>, vector<1x8x8xf32> -> vector<1x8x8xf32>
    "tpu.trace_stop"() : () -> ()
    %c0_9 = arith.constant 0 : index
    %c0_10 = arith.constant 0 : index
    %c0_11 = arith.constant 0 : index
    %13 = vector.load %arg8[%c0_9, %c0_10, %c0_11] : memref<1x8x1xf32, #tpu.memory_space<vmem>>, vector<1x8x1xf32>
    %cst_12 = arith.constant dense<0xFF800000> : vector<1x8xf32>
    %14 = vector.multi_reduction <maximumf>, %12, %cst_12 [2] : vector<1x8x8xf32> to vector<1x8xf32>
    %15 = vector.shape_cast %14 : vector<1x8xf32> to vector<1x8x1xf32>
    %16 = arith.maximumf %13, %15 : vector<1x8x1xf32>
    %17 = arith.subf %13, %16 : vector<1x8x1xf32>
    %18 = math.exp %17 : vector<1x8x1xf32>
    %19 = vector.broadcast %16 : vector<1x8x1xf32> to vector<1x8x8xf32>
    %20 = arith.subf %12, %19 : vector<1x8x8xf32>
    %21 = math.exp %20 : vector<1x8x8xf32>
    %c0_13 = arith.constant 0 : index
    %c0_14 = arith.constant 0 : index
    %c0_15 = arith.constant 0 : index
    %22 = vector.load %arg9[%c0_13, %c0_14, %c0_15] : memref<1x8x1xf32, #tpu.memory_space<vmem>>, vector<1x8x1xf32>
    %23 = arith.mulf %18, %22 : vector<1x8x1xf32>
    %cst_16 = arith.constant dense<0.000000e+00> : vector<1x8xf32>
    %24 = vector.multi_reduction <add>, %21, %cst_16 [2] : vector<1x8x8xf32> to vector<1x8xf32>
    %25 = vector.shape_cast %24 : vector<1x8xf32> to vector<1x8x1xf32>
    %26 = arith.addf %23, %25 : vector<1x8x1xf32>
    %c0_17 = arith.constant 0 : index
    %c0_18 = arith.constant 0 : index
    %c0_19 = arith.constant 0 : index
    %27 = vector.load %arg9[%c0_17, %c0_18, %c0_19] : memref<1x8x1xf32, #tpu.memory_space<vmem>>, vector<1x8x1xf32>
    tpu.vector_store %arg9[%c0_17, %c0_18, %c0_19], %26 {strides = array<i32>} : memref<1x8x1xf32, #tpu.memory_space<vmem>>, vector<1x8x1xf32>,
    %c0_20 = arith.constant 0 : index
    %c0_21 = arith.constant 0 : index
    %c0_22 = arith.constant 0 : index
    %28 = vector.load %arg10[%c0_20, %c0_21, %c0_22] : memref<1x8x128xf32, #tpu.memory_space<vmem>>, vector<1x8x128xf32>
    %29 = vector.broadcast %18 : vector<1x8x1xf32> to vector<1x8x128xf32>
    %30 = arith.mulf %29, %28 : vector<1x8x128xf32>
    "tpu.trace_start"() <{level = 10 : i32, message = "bqk,bkd->bqd"}> : () -> ()
    %cst_23 = arith.constant dense<0.000000e+00> : vector<1x8x128xf32>
    %31 = tpu.matmul %21, %10, %cst_23 {dimension_numbers = #tpu.dot_dimension_numbers<[2], [1], [1], [2], [0, 0, 0, 1, 1, 2], [0], [0]>} : vector<1x8x8xf32>, vector<1x8x128xf32>, vector<1x8x128xf32> -> vector<1x8x128xf32>
    "tpu.trace_stop"() : () -> ()
    %32 = arith.addf %30, %31 : vector<1x8x128xf32>
    %c0_24 = arith.constant 0 : index
    %c0_25 = arith.constant 0 : index
    %c0_26 = arith.constant 0 : index
    %33 = vector.load %arg10[%c0_24, %c0_25, %c0_26] : memref<1x8x128xf32, #tpu.memory_space<vmem>>, vector<1x8x128xf32>
    tpu.vector_store %arg10[%c0_24, %c0_25, %c0_26], %32 {strides = array<i32>} : memref<1x8x128xf32, #tpu.memory_space<vmem>>, vector<1x8x128xf32>,
    %c0_27 = arith.constant 0 : index
    %c0_28 = arith.constant 0 : index
    %c0_29 = arith.constant 0 : index
    %34 = vector.load %arg8[%c0_27, %c0_28, %c0_29] : memref<1x8x1xf32, #tpu.memory_space<vmem>>, vector<1x8x1xf32>
    tpu.vector_store %arg8[%c0_27, %c0_28, %c0_29], %16 {strides = array<i32>} : memref<1x8x1xf32, #tpu.memory_space<vmem>>, vector<1x8x1xf32>,
    %c0_i32_30 = arith.constant 0 : i32
    %35 = arith.cmpi eq, %arg1, %c0_i32_30 : i32
    %36 = arith.extui %35 : i1 to i32
    %c0_i32_31 = arith.constant 0 : i32
    %37 = arith.cmpi ne, %36, %c0_i32_31 : i32
    scf.if %37 {
      %c0_32 = arith.constant 0 : index
      %c0_33 = arith.constant 0 : index
      %c0_34 = arith.constant 0 : index
      %38 = vector.load %arg10[%c0_32, %c0_33, %c0_34] : memref<1x8x128xf32, #tpu.memory_space<vmem>>, vector<1x8x128xf32>
      %c0_35 = arith.constant 0 : index
      %c0_36 = arith.constant 0 : index
      %c0_37 = arith.constant 0 : index
      %39 = vector.load %arg9[%c0_35, %c0_36, %c0_37] : memref<1x8x1xf32, #tpu.memory_space<vmem>>, vector<1x8x1xf32>
      %40 = tpu.reciprocal %39 {approx = true} : vector<1x8x1xf32> -> vector<1x8x1xf32>
      %41 = vector.broadcast %40 : vector<1x8x1xf32> to vector<1x8x128xf32>
      %42 = arith.mulf %38, %41 : vector<1x8x128xf32>
      %c0_38 = arith.constant 0 : index
      %c0_39 = arith.constant 0 : index
      %c0_40 = arith.constant 0 : index
      %43 = vector.load %arg6[%c0_38, %c0_39, %c0_40] : memref<1x8x128xf32, #tpu.memory_space<vmem>>, vector<1x8x128xf32>
      tpu.vector_store %arg6[%c0_38, %c0_39, %c0_40], %42 {strides = array<i32>} : memref<1x8x128xf32, #tpu.memory_space<vmem>>, vector<1x8x128xf32>,
    } else {
    }
    return
  }
  func.func @transform_0(%arg0: i32, %arg1: i32) -> (i32, i32, i32) {
    %c0_i32 = arith.constant 0 : i32
    %c0_i32_0 = arith.constant 0 : i32
    %c0_i32_1 = arith.constant 0 : i32
    return %arg0, %c0_i32, %c0_i32_0 : i32, i32, i32
  }
  func.func @transform_1(%arg0: i32, %arg1: i32) -> (i32, i32, i32) {
    %c0_i32 = arith.constant 0 : i32
    %c0_i32_0 = arith.constant 0 : i32
    return %arg0, %arg1, %c0_i32 : i32, i32, i32
  }
  func.func @transform_2(%arg0: i32, %arg1: i32) -> (i32, i32) {
    %c0_i32 = arith.constant 0 : i32
    %c0_i32_0 = arith.constant 0 : i32
    %c0_i32_1 = arith.constant 0 : i32
    return %c0_i32, %c0_i32_0 : i32, i32
  }
  func.func @transform_3(%arg0: i32, %arg1: i32) -> (i32, i32) {
    %c0_i32 = arith.constant 0 : i32
    %c0_i32_0 = arith.constant 0 : i32
    %c0_i32_1 = arith.constant 0 : i32
    return %c0_i32, %c0_i32_0 : i32, i32
  }
  func.func @transform_4(%arg0: i32, %arg1: i32) -> (i32, i32, i32) {
    %c0_i32 = arith.constant 0 : i32
    %c0_i32_0 = arith.constant 0 : i32
    %c0_i32_1 = arith.constant 0 : i32
    return %arg0, %c0_i32, %c0_i32_0 : i32, i32, i32
  }
}

</mosaic_0001>

<bundles_post_ra>
// kernel: tpu_custom_call.1
= control target key start
LH: loop header
LB: loop body
LE: loop exit
PB: predicated region body
PF: predicated region fallthrough
CT: control target
= control target key end

     0   :  { %s1396_s0 = inlined_call_operand.hbm [shape: f32[2,8,16], index: 0, kind: input, shape index: {}]   ;;  %s1397_s1 = inlined_call_operand.hbm [shape: f32[2,8,32], index: 1, kind: input, shape index: {}]   ;;  %s1398_s2 = inlined_call_operand.hbm [shape: f32[16,128], index: 2, kind: input, shape index: {}]   ;;  %s1399_s3 = inlined_call_operand.hbm [shape: f32[32,256], index: 3, kind: input, shape index: {}]   ;;  %s1400_s4 = inlined_call_operand.hbm [shape: f32[2,8,128], index: 4, kind: output, shape index: {}]  }
   0x1   :  { %1402 = sst [smem:[#allocation20_spill]] %s1396_s0 }
   0x2   :  { %1403 = sst [smem:[#allocation21_spill]] %s1397_s1 }
   0x3   :  { %9 = vsyncpa [#allocation7], 0 }
   0x4   :  { %11 = vsyncpa [#allocation7 + $0x1], 0 }
   0x5   :  { %12 = vsyncpa [#allocation10], 0 }
   0x6   :  { %14 = vsyncpa [#allocation10 + $0x1], 0 }
   0x7   :  { %15 = vsyncpa [#allocation13], 0 }
   0x8   :  { %16 = vsyncpa [#allocation8], 0 }
   0x9   :  { %18 = vsyncpa [#allocation8 + $0x1], 0  ;;  %s1183_s15 = smov 0   ;;  %s1185_s16 = smov 0  }
   0xa   :  { %s1187_s17 = smov 0   ;;  %s1189_s18 = smov 0  }
   0xb   :  { %s1191_s19 = smov 0   ;;  %s1193_s20 = smov 0  }
   0xc LB: > { %s1214_s21 = sadd.s32 4294967295, %s1143_s20   ;;  %s793_s22 = sadd.s32 4294967294, %s1143_s20   ;;  %s1143_s20 = sphi %s1193_s20, %s24_s20   ;;  %s1139_s19 = sphi %s1191_s19, %s1423_s19   ;;  %s1135_s18 = sphi %s1189_s18, %s1422_s18   ;;  %s1131_s17 = sphi %s1187_s17, %s1421_s17   ;;  %s1127_s16 = sphi %s1185_s16, %s1420_s16   ;;  %s1123_s15 = sphi %s1183_s15, %s1419_s15  }
   0xd   : > { %p56_p0 = scmp.ne.s32.totalorder %s1127_s16, %s1123_s15  ;;  %p1401_p1 = scmp.eq.s32.totalorder %s1214_s21, 0 }
   0xe   : > { %p156_p3 = scmp.eq.s32.totalorder %s793_s22, 1  ;;  %p794_p5 = scmp.ge.s32.totalorder %s1143_s20, 1 }
   0xf   : > { %p1223_p4 = por %p1401_p1, %p56_p0  ;;  %p163_p7 = scmp.lt.s32.totalorder %s1143_s20, 3 }
  0x10   : > { %p1228_p6 = por %p156_p3, %p56_p0  ;;  %s1145_s26 = smov [#allocation11]  }
  0x11   : > { %p1233_p8 = pnand %p794_p5, %p163_p7  ;;  %s175_s27 = sshll.u32 %s1145_s26, 4  ;;  %s176_s27 = int_to_ptr.vmem [resolvable:$true] %s175_s27 }
  0x12   : > { %s1405_s24 = scalar_select %p1228_p6, 1, 0 }
  0x13   : > { %p853_p9 = pneg %p1233_p8  ;;  %s1146_s29 = smov [#allocation12]  }
  0x14   : > { %s188_s30 = sshll.u32 %s1146_s29, 4  ;;  %s954_s5 = scalar_lea.vmem %s176_s27, 256  ;;  %s189_s30 = int_to_ptr.vmem [resolvable:$true] %s188_s30 }
  0x15   : > { %p1242_p11 = pnand %p853_p9, %p1401_p1  ;;  %p955_p13 = scmp.ne.s32.totalorder %s176_s27, %s954_s5 }
  0x16   : > { %p962_p5 = scmp.lt.s32.totalorder %s176_s27, %s176_s27  ;;  %p963_p7 = scmp.lt.s32.totalorder %s954_s5, %s954_s5 }
  0x17   : > { %p945_p12 = pneg %p1242_p11 }
  0x18   : > { %p964_p10 = por %p963_p7, %p962_p5 }
  0x19   : > { %p957_p0 = pnand %p955_p13, %p945_p12 }
  0x1b   : > { %p958_p3 = pneg %p957_p0 }
  0x1d   : > { %p965_p9 = pnand %p964_p10, %p958_p3 }
  0x1f   : > { %968 = shalt.err (!%p965_p9)
}
  0x20   : > { %s1147_s6 = smov 128   ;;  %s1148_s7 = smov 8  }
  0x21   : > { %856 = dma.hbm_to_vmem [thread:$0]  (!%p1242_p11), %s1398_s2, 256, %s176_s27, [#allocation10], %s1147_s6, %s1147_s6, %s1148_s7  }
  0x22   : > { %s980_s10 = scalar_lea.vmem %s189_s30, 1024  ;;  %p988_p2 = scmp.lt.s32.totalorder %s189_s30, %s189_s30 }
  0x23   : > { %p981_p1 = scmp.ne.s32.totalorder %s189_s30, %s980_s10  ;;  %p989_p6 = scmp.lt.s32.totalorder %s980_s10, %s980_s10 }
  0x25   : > { %p983_p13 = pnand %p981_p1, %p945_p12  ;;  %p990_p5 = por %p989_p6, %p988_p2 }
  0x27   : > { %p984_p0 = pneg %p983_p13 }
  0x29   : > { %p991_p10 = pnand %p990_p5, %p984_p0 }
  0x2b   : > { %994 = shalt.err (!%p991_p10)
}
  0x2c   : > { %s1149_s11 = smov 256   ;;  %s1150_s12 = smov 16  }
  0x2d   : > { %859 = dma.hbm_to_vmem [thread:$0]  (!%p1242_p11), %s1399_s3, 1024, %s189_s30, [#allocation13], %s1149_s11, %s1149_s11, %s1150_s12  }
  0x2e   : > { %s36_s22 = sadd.s32 1, %s1139_s19  ;;  %s43_s26 = sadd.s32 1, %s1131_s17 }
  0x2f   : > { %p38_p1 = scmp.ge.s32.totalorder %s36_s22, 2  ;;  %p50_p2 = scmp.ne.s32.totalorder %s1131_s17, %s1127_s16 }
  0x30   : > { %p51_p6 = scmp.eq.s32.totalorder %s1143_s20, 0  ;;  %p873_p12 = scmp.lt.s32.totalorder %s1143_s20, 2 }
  0x31   : > { %s1425_s22 = smov (%p38_p1, %s36_s22), 0  ;;  %p1408_p7 = scmp.eq.s32.totalorder %s1214_s21, 1 }
  0x32   : > { %p52_p3 = por %p51_p6, %p50_p2  ;;  %s40_s28 = ssub.s32 %s1139_s19, %s1425_s22 }
  0x33   : > { %p1274_p9 = por %p1408_p7, %p50_p2  ;;  %s202_s29 = sand.u32 1, %s1131_s17  }
  0x34   : > { %p41_p13 = scmp.eq.s32.totalorder %s40_s28, 0  ;;  %s798_s30 = sshll.u32 %s202_s29, 3 }
  0x35   : > { %s799_s5 = sshll.u32 %s1139_s19, 7  ;;  %s1410_s0 = sld [smem:[#allocation20_spill]] }
  0x36   : > { %s1283_s6 = scalar_select %p41_p13, %s1131_s17, %s43_s26  }
  0x37   : > { %s206_s10 = scalar_lea.vmem [#allocation6], %s798_s30  ;;  %p1290_p11 = pnand %p873_p12, %p52_p3 }
  0x38   : > { %s213_s11 = sshll.u32 %s206_s10, 4  ;;  %s1412_s1 = sld [smem:[#allocation21_spill]]  ;;  %s214_s11 = int_to_ptr.vmem [resolvable:$true] %s213_s11 }
  0x39   : > { %s203_s26 = scalar_lea.sflag [#allocation7], %s202_s29  ;;  %p997_p0 = pneg %p1290_p11 }
  0x3a   : > { %s1008_s7 = scalar_lea.vmem %s214_s11, 128  ;;  %s1151_s8 = smov [#allocation6]  }
  0x3b   : > { %s211_s9 = scalar_lea.hbm %s1410_s0, %s799_s5  ;;  %p1009_p5 = scmp.ne.s32.totalorder %s214_s11, %s1008_s7 }
  0x3c   : > { %s1013_s10 = sshll.u32 %s1151_s8, 4  ;;  %s1014_s10 = int_to_ptr.vmem [resolvable:$false] %s1013_s10 }
  0x3d   : > { %p1011_p10 = pnand %p1009_p5, %p997_p0  ;;  %s1015_s0 = scalar_lea.vmem %s1014_s10, 256 }
  0x3e   : > { %s1297_s28 = scalar_lea.hbm %s1412_s1, %s799_s5  ;;  %p1016_p2 = scmp.lt.s32.totalorder %s214_s11, %s1014_s10 }
  0x3f   : > { %p1012_p1 = pneg %p1011_p10  ;;  %p1017_p6 = scmp.lt.s32.totalorder %s1015_s0, %s1008_s7 }
  0x41   : > { %p1018_p12 = por %p1017_p6, %p1016_p2 }
  0x43   : > { %p1019_p3 = pnand %p1018_p12, %p1012_p1 }
  0x45   : > { %1022 = shalt.err (!%p1019_p3)
}
  0x46   : > { %863 = dma.hbm_to_vmem [thread:$0]  (!%p1290_p11), %s211_s9, 128, %s214_s11, %s203_s26  }
  0x47   : > { %s220_s29 = sand.u32 1, %s1143_s20   ;;  %s224_s5 = scalar_lea.vmem [#allocation9], %s798_s30 }
  0x48   : > { %s232_s13 = sshll.u32 %s224_s5, 4  ;;  %s221_s14 = scalar_lea.sflag [#allocation10], %s220_s29  ;;  %s233_s13 = int_to_ptr.vmem [resolvable:$true] %s232_s13 }
  0x49   : > { %s1036_s1 = scalar_lea.vmem %s233_s13, 128  ;;  %s1152_s0 = smov [#allocation9]  }
  0x4a   : > { %p1037_p7 = scmp.ne.s32.totalorder %s233_s13, %s1036_s1  ;;  %s1041_s7 = sshll.u32 %s1152_s0, 4  ;;  %s1042_s7 = int_to_ptr.vmem [resolvable:$false] %s1041_s7 }
  0x4b   : > { %s1043_s8 = scalar_lea.vmem %s1042_s7, 256  ;;  %p1044_p10 = scmp.lt.s32.totalorder %s233_s13, %s1042_s7 }
  0x4c   : > { %p1039_p13 = pnand %p1037_p7, %p997_p0  ;;  %p1045_p1 = scmp.lt.s32.totalorder %s1043_s8, %s1036_s1 }
  0x4e   : > { %p1040_p5 = pneg %p1039_p13  ;;  %p1046_p2 = por %p1045_p1, %p1044_p10 }
  0x50   : > { %p1047_p6 = pnand %p1046_p2, %p1040_p5 }
  0x52   : > { %1050 = shalt.err (!%p1047_p6)
}
  0x53   : > { %866 = dma.hbm_to_vmem [thread:$0]  (!%p1290_p11), %s1297_s28, 128, %s233_s13, %s221_s14  }
  0x54   : > { %241 = sbr.rel (%p1233_p8) target bundleno = 1083 (0x43b), region = 36  ;;  %s1316_s30 = sand.u32 (!%p1233_p8), 1, %s1127_s16  }
  0x55   : > { %s1319_s9 = sshll.u32 (!%p1233_p8), %s1316_s30, 3  ;;  %s244_s1 = scalar_lea.sflag (!%p1233_p8), [#allocation7], %s1316_s30 }
  0x56   : > { %s247_s11 = scalar_lea.vmem (!%p1233_p8), [#allocation6], %s1319_s9 }
  0x59   : > { %1102 = dma.done.wait (%p1223_p4), %s244_s1, 128  }
  0x5a   : > { %1104 = vsyncadd (%p1223_p4), %s244_s1, 4294967168  ;;  %s252_s25 = sand.u32 1, %s1214_s21   ;;  %s256_s28 = scalar_lea.vmem [#allocation9], %s1319_s9 }
  0x5b   : > { %s253_s12 = scalar_lea.sflag [#allocation10], %s252_s25 }
  0x5c   : > { %1106 = dma.done.wait (%p1223_p4), %s253_s12, 128  }
  0x5d   : > { %1108 = vsyncadd (%p1223_p4), %s253_s12, 4294967168  ;;  %p1413_p8 = scmp.eq.s32.totalorder %s1214_s21, 0 }
  0x5f   : > { %1110 = dma.done.wait (%p1413_p8), [#allocation10], 256   ;;  %p1414_p11 = pmov %p1413_p8 }
  0x60   : > { %p1415_p0 = pmov %p1413_p8 }
  0x61   : > { %1112 = vsyncadd (%p1414_p11), [#allocation10], 4294967040 }
  0x62   : > { %1114 = dma.done.wait (%p1415_p0), [#allocation13], 1024   ;;  %p1416_p12 = pmov %p1415_p0 }
  0x63   : > { %v1153_v0 = vmov 0.0   ;;  %vm1154_vm0 = vmmov 0   ;;  %v389_v1 = vld [vmem:[#allocation12 + $0x38] sm:$0xff]  ;;  %v388_v2 = vld [vmem:[#allocation12 + $0x30] sm:$0xff]  ;;  %v387_v3 = vld [vmem:[#allocation12 + $0x28] sm:$0xff]  ;;  %vm301_vm1 = vcmask 130048  }
  0x64   : > { %1116 = vsyncadd (%p1416_p12), [#allocation13], 4294966272  ;;  %822 = vmatprep.subr.mxu0 %v1153_v0  ;;  %826 = vmatprep.mubr.msk.f32.mxu0 %vm1154_vm0, %v1153_v0  ;;  %v386_v4 = vld [vmem:[#allocation12 + $0x20] sm:$0xff]  ;;  %v300_v5 = vld [vmem:[#allocation11 + $0x8] sm:$0xff]  ;;  %vm390_vm2 = vcmask 261120   ;;  %vm377_vm3 = vcmask 7168  }
  0x65   : > { %458 = vmatprep.mubr.f32.mxu1 %v1153_v0  ;;  %418 = vmatprep.subr.mxu1 %v389_v1  ;;  %v385_v6 = vld [vmem:[#allocation12 + $0x18] sm:$0xff]  ;;  %v299_v7 = vld [vmem:[#allocation11] sm:$0xff]  ;;  %v383_v10 = vld [vmem:[#allocation12 + $0x8] sm:$0xff]  ;;  %v1155_v18 = vmov -inf   ;;  %379 = vst.msk [vmem:[#allocation4] sm:$0xff] %vm377_vm3, %v1153_v0  ;;  %vm537_vm4 = vcmask 64512  }
  0x66   : > { %419 = vmatpush1.msra.mxu1 %v388_v2  ;;  %823 = vmatpush3.msra.mxu0 %v300_v5  ;;  %v384_v8 = vld [vmem:[#allocation12 + $0x10] sm:$0xff]  ;;  %v382_v11 = vld [vmem:[#allocation12] sm:$0xff]  ;;  %378 = vst.msk [vmem:[#allocation3] sm:$0xff] %vm377_vm3, %v1155_v18  ;;  %v1156_v22 = vmov 0   ;;  %s812_s21 = sshll.u32 %s1135_s18, 7  ;;  %s293_s23 = scalar_lea.vmem [#allocation14], %s1319_s9 }
  0x67   : > { %420 = vmatprep.subr.mxu1 %v387_v3  ;;  %824 = vmatprep.subr.mxu0 %v1153_v0  ;;  %v298_v9 = vld [vmem:[%s247_s11] sm:$0xff]  ;;  %v381_v12 = vld [vmem:[%s256_s28] sm:$0xff]  ;;  %s671_s26 = sshll.u32 %s293_s23, 4  ;;  %s669_s5 = scalar_lea.hbm %s1400_s4, %s812_s21  ;;  %s672_s26 = int_to_ptr.vmem [resolvable:$true] %s671_s26 }
  0x68   : > { %421 = vmatpush1.msra.mxu1 %v386_v4  ;;  %825 = vmatpush3.msra.mxu0 %v299_v7  ;;  %s658_s13 = scalar_lea.sflag [#allocation8], %s1316_s30  ;;  %s1051_s14 = scalar_lea.vmem %s672_s26, 128 }
  0x69   : > { %422 = vmatprep.subr.mxu1 %v385_v6  ;;  %827 = vmatmul.mubr.msk.f32.vlgmr.msra.gmra.mxu0 %vm301_vm1, %v298_v9  ;;  %p1052_p4 = scmp.ne.s32.totalorder %s672_s26, %s1051_s14  ;;  %s1157_s0 = smov [#allocation14]  }
  0x6a   : > { %423 = vmatpush1.msra.mxu1 %v384_v8  ;;  %829 = vmatprep.subr.mxu0 %v1153_v0  ;;  %s1055_s7 = sshll.u32 %s1157_s0, 4  ;;  %s1056_s7 = int_to_ptr.vmem [resolvable:$false] %s1055_s7 }
  0x6b   : > { %424 = vmatprep.subr.mxu1 %v383_v10  ;;  %831 = vmatprep.mubr.msk.f32.mxu0 %vm1154_vm0, %v1153_v0  ;;  %p1053_p3 = pnand %p1052_p4, %p1274_p9  ;;  %s1057_s18 = scalar_lea.vmem %s1056_s7, 256 }
  0x6c   : > { %425 = vmatpush1.msra.mxu1 %v382_v11  ;;  %935 = vset.pattern.permute.xlu0 %v1156_v22  ;;  %v553_v34 = vld [vmem:[#allocation4] sm:$0xff]  ;;  %p1058_p13 = scmp.lt.s32.totalorder %s672_s26, %s1056_s7  ;;  %p1059_p5 = scmp.lt.s32.totalorder %s1057_s18, %s1051_s14 }
  0x6d   : > { %809 = vmatmul.mubr.msk.f32.vlgmr.msra.gmra.mxu1 %vm390_vm2, %v381_v12  ;;  %936 = vset.pattern.permute.xlu1 %v1156_v22  ;;  %v536_v23 = vld [vmem:[#allocation3] sm:$0xff]  ;;  %p1054_p7 = pneg %p1053_p3 }
  0x6e   : > { %p1060_p10 = por %p1059_p5, %p1058_p13 }
  0x70   : > { %p1061_p1 = pnand %p1060_p10, %p1054_p7 }
 0x129   : > { %v371_v13 = vpop.f32.mrf.mxu0 }
 0x12a   : > { %v375_v15 = vmul.f32 0.17677669, %v371_v13 }
 0x12b   : > { %v828_v14 = vpop.f32.mrf.mxu0 }
 0x12d   : > { %v460_v16 = vpop.f32.mrf.mxu1 }
 0x12e   : > { %830 = vmatpush3.xpose.msra.mxu0 %v460_v16 }
 0x12f   : > { %834 = vmatprep.subr.mxu0 %v1153_v0  ;;  %v462_v17 = vpop.f32.mrf.mxu1 }
 0x131   : > { %832 = vmatmul.mubr.f32.vlgmr.msra.gmra.mxu0 %v375_v15 }
 0x132   : > { %835 = vmatpush3.msra.mxu0 %v462_v17  ;;  %836 = vmatprep.mubr.msk.f32.mxu0 %vm1154_vm0, %v1153_v0 }
 0x1f1   : > { %v532_v19 = vpop.f32.mrf.mxu0 }
 0x1f2   : > { %v538_v20 = vsel %vm537_vm4, %v532_v19, -inf }
 0x1f3   : > { %539 = vmax.xlane.f32.xlu0 %v538_v20  ;;  %v833_v21 = vpop.f32.mrf.mxu0 }
 0x27c   : > { %v540_v24 = vpop.xlane.xlu0 %539 }
 0x27d   : > { %v541_v25 = vmax.f32 %v536_v23, %v540_v24 }
 0x27f   : > { %v542_v26 = vsub.f32 %v536_v23, %v541_v25  ;;  %643 = vst.msk [vmem:[#allocation3] sm:$0xff] %vm377_vm3, %v541_v25  ;;  %547 = vperm.xlu0 %935, %v541_v25  }
 0x281   : > { %v543_v31 = vmul.f32 1.442695, %v542_v26 }
 0x2fa   : > { %v548_v27 = vpop.permute.xlu0 %547 }
 0x2fb   : > { %v550_v28 = vsub.f32 %v532_v19, %v548_v27 }
 0x2fd   : > { %v551_v29 = vmul.f32 1.442695, %v550_v28 }
 0x2ff   : > { %937 = vpow2.f32 %v551_v29 }
 0x300   : > { %939 = vpow2.f32 %v543_v31 }
 0x30c   : > { %v938_v30 = vpop.eup %937 }
 0x30d   : > { %837 = vmatmul.mubr.msk.f32.vlgmr.msra.gmra.mxu0 %vm537_vm4, %v938_v30  ;;  %v555_v32 = vsel %vm537_vm4, %v938_v30, 0.0  ;;  %v940_v33 = vpop.eup %939 }
 0x30e   : > { %556 = vadd.xlane.f32.xlu1 %v555_v32  ;;  %v554_v35 = vmul.f32 %v940_v33, %v553_v34 }
 0x31f   : > { %564 = vperm.xlu1 %936, %v940_v33  }
 0x397   : > { %v557_v36 = vpop.xlane.xlu1 %556 }
 0x398   : > { %v558_v37 = vadd.f32 %v557_v36, %v554_v35 }
 0x39a   : > { %560 = vst.msk [vmem:[#allocation4] sm:$0xff] %vm377_vm3, %v558_v37 }
 0x39b   : > { %v565_v42 = vpop.permute.xlu1 %564 }
 0x39c   : > { %v567_v43 = vmul.f32 0.0, %v565_v42 }
 0x3a1   : > { %v648_v38 = vld [vmem:[#allocation4] sm:$0xff] }
 0x3a2   : > { %941 = vrcp.f32 %v648_v38 }
 0x3af   : > { %v942_v39 = vpop.eup %941 }
 0x3b0   : > { %652 = vperm.xlu1 %936, %v942_v39  }
 0x3cd   : > { %v637_v40 = vpop.f32.mrf.mxu0 }
 0x3ce   : > { %v641_v44 = vadd.f32 %v637_v40, %v567_v43 }
 0x3cf   : > { %v838_v41 = vpop.f32.mrf.mxu0 }
 0x42b   : > { %v653_v45 = vpop.permute.xlu1 %652 }
 0x42c   : > { %v655_v46 = vmul.f32 %v653_v45, %v641_v44 }
 0x42e   : > { %656 = vst [vmem:[%s293_s23] sm:$0xff] %v655_v46 }
 0x42f   : > { %1064 = shalt.err (!%p1061_p1)
}
 0x430   : > { %s1065_s8 = scalar_lea.hbm %s669_s5, 128  ;;  %s1069_s1 = scalar_lea.hbm %s1400_s4, 256 }
 0x431   : > { %p1066_p2 = scmp.ne.s32.totalorder %s669_s5, %s1065_s8  ;;  %p1070_p11 = scmp.lt.s32.totalorder %s669_s5, %s1400_s4 }
 0x432   : > { %p1071_p0 = scmp.lt.s32.totalorder %s1069_s1, %s1065_s8 }
 0x433   : > { %p1067_p6 = pnand %p1066_p2, %p1274_p9 }
 0x434   : > { %p1072_p12 = por %p1071_p0, %p1070_p11 }
 0x435   : > { %p1068_p8 = pneg %p1067_p6 }
 0x437   : > { %p1073_p4 = pnand %p1072_p12, %p1068_p8 }
 0x439   : > { %1076 = shalt.err (!%p1073_p4)
}
 0x43a   : > { %851 = dma.vmem_to_hbm [thread:$0]  (%p1274_p9), %s672_s26, 128, %s669_s5, %s658_s13  }
 0x43b PF: > { %s683_s12 = sand.u32 1, %s1123_s15   ;;  %p1417_p3 = scmp.ne.s32.totalorder %s1405_s24, 0 }
 0x43c   : > { %p1418_p7 = scmp.ge.s32.totalorder %s1143_s20, 2  ;;  %s684_s28 = scalar_lea.sflag [#allocation8], %s683_s12 }
 0x43e   : > { %p868_p13 = pnand %p1418_p7, %p1417_p3 }
 0x440   : > { %p869_p5 = pneg %p868_p13 }
 0x442   : > { %1118 = dma.done.wait (%p869_p5), %s684_s28, 128  }
 0x443   : > { %1120 = vsyncadd (%p869_p5), %s684_s28, 4294967168  ;;  %s24_s20 = sadd.s32 1, %s1143_s20   ;;  %s1419_s15 = smov %s1127_s16 }
 0x444   : > { %p21_p10 = scmp.ge.s32.totalorder %s24_s20, 4   ;;  %s1420_s16 = smov %s1131_s17 }
 0x445   : > { %s1421_s17 = smov %s1283_s6  ;;  %s1422_s18 = smov %s1139_s19 }
 0x446   : > { %s1423_s19 = smov %s1425_s22  ;;  %23 = sbr.rel (!%p21_p10) target bundleno = 12 (0xc), region = 110 }
 0x44b   :  { %689 = vsyncpa [#allocation7], 1 }
 0x44c   :  { %691 = vsyncpa [#allocation7 + $0x1], 1 }
 0x44d   :  { %692 = vsyncpa [#allocation10], 1 }
 0x44e   :  { %694 = vsyncpa [#allocation10 + $0x1], 1 }
 0x44f   :  { %695 = vsyncpa [#allocation13], 1 }
 0x450   :  { %696 = vsyncpa [#allocation8], 1 }
 0x451   :  { %698 = vsyncpa [#allocation8 + $0x1], 1 }

</bundles_post_ra>
